<compile_context>
chip_gen: v7x
topology: tpu7x:2x2x1
jax: 0.10.0
libtpu: 0.0.40
codegen_flags: <defaults>
</compile_context>

<pallas_src>
import functools

import jax
import jax.numpy as jnp
from jax import lax
from jax.experimental import pallas as pl
from jax.experimental.pallas import tpu as pltpu

INPUT_SIZE = 10
HIDDEN_SIZE = 20
OUTPUT_SIZE = 5

# Rows of the batch processed per grid step.  Capped at ~4K because the
# (tb, 10)/(tb, 5) blocks are lane-padded to 128 in VMEM (sweep 2048-8192 if
# tuning per generation).
BATCH_TILE = 4096


def ffn_kernel(x_ref, w1_ref, b1_ref, w2_ref, b2_ref, o_ref):
    # x_ref:  (tb, IN)       w1_ref: (HID, IN)   b1_ref: (1, HID)
    # w2_ref: (OUT, HID)     b2_ref: (1, OUT)    o_ref:  (tb, OUT)
    x = x_ref[...]
    # h = x @ W1^T : contraction over the feature dim of both operands, so the
    # transpose happens inside the MXU, never in HBM.
    h = lax.dot_general(
        x, w1_ref[...],
        dimension_numbers=(((1,), (1,)), ((), ())),
        preferred_element_type=jnp.float32,
    )
    h = jnp.maximum(h + b1_ref[...], 0.0)          # bias + ReLU
    # y = h @ W2^T
    y = lax.dot_general(
        h, w2_ref[...],
        dimension_numbers=(((1,), (1,)), ((), ())),
        preferred_element_type=jnp.float32,
    )
    o_ref[...] = (y + b2_ref[...]).astype(o_ref.dtype)


def _round_up(n, m):
    return ((n + m - 1) // m) * m


@functools.partial(jax.jit, static_argnames=("batch_tile",))
def feedforward_nn(x, w1, b1, w2, b2, *, batch_tile=BATCH_TILE):
    """x: (B, INPUT_SIZE) f32; w1: (HID, IN); b1: (HID,); w2: (OUT, HID); b2: (OUT,).

    Returns (B, OUTPUT_SIZE) f32, matching PyTorch fc2(relu(fc1(x))).
    """
    B = x.shape[0]

    # Tile the batch (sublane) axis; keep it a multiple of 8 for clean layout.
    tb = min(batch_tile, _round_up(B, 8))
    grid = (pl.cdiv(B, tb),)   # ragged final block handled by Pallas

    b1r = b1.reshape(1, HIDDEN_SIZE).astype(jnp.float32)
    b2r = b2.reshape(1, OUTPUT_SIZE).astype(jnp.float32)

    cost = pl.CostEstimate(
        flops=2 * B * (INPUT_SIZE * HIDDEN_SIZE + HIDDEN_SIZE * OUTPUT_SIZE),
        transcendentals=0,
        bytes_accessed=4 * (B * (INPUT_SIZE + OUTPUT_SIZE)
                            + HIDDEN_SIZE * (INPUT_SIZE + 1)
                            + OUTPUT_SIZE * (HIDDEN_SIZE + 1)),
    )

    return pl.pallas_call(
        ffn_kernel,
        out_shape=jax.ShapeDtypeStruct((B, OUTPUT_SIZE), x.dtype),
        grid=grid,
        in_specs=[
            # activations: tile over the batch (row) axis, natural layout
            pl.BlockSpec((tb, INPUT_SIZE), lambda i: (i, 0)),
            # weights / biases: constant block index -> stay resident in VMEM
            pl.BlockSpec((HIDDEN_SIZE, INPUT_SIZE), lambda i: (0, 0)),
            pl.BlockSpec((1, HIDDEN_SIZE), lambda i: (0, 0)),
            pl.BlockSpec((OUTPUT_SIZE, HIDDEN_SIZE), lambda i: (0, 0)),
            pl.BlockSpec((1, OUTPUT_SIZE), lambda i: (0, 0)),
        ],
        out_specs=pl.BlockSpec((tb, OUTPUT_SIZE), lambda i: (i, 0)),
        compiler_params=pltpu.CompilerParams(
            dimension_semantics=("parallel",),
            vmem_limit_bytes=32 * 1024 * 1024,
        ),
        cost_estimate=cost,
    )(x, w1, b1r, w2, b2r)


def init_params(key):
    # Deterministic init mirroring nn.Linear's U(-1/sqrt(fan_in), 1/sqrt(fan_in)),
    # with PyTorch-native layouts: W1 (HID, IN), W2 (OUT, HID).
    k1, k2, k3, k4 = jax.random.split(key, 4)
    bound1 = 1.0 / jnp.sqrt(INPUT_SIZE)
    bound2 = 1.0 / jnp.sqrt(HIDDEN_SIZE)
    w1 = jax.random.uniform(k1, (HIDDEN_SIZE, INPUT_SIZE), jnp.float32,
                            -bound1, bound1)
    b1 = jax.random.uniform(k2, (HIDDEN_SIZE,), jnp.float32, -bound1, bound1)
    w2 = jax.random.uniform(k3, (OUTPUT_SIZE, HIDDEN_SIZE), jnp.float32,
                            -bound2, bound2)
    b2 = jax.random.uniform(k4, (OUTPUT_SIZE,), jnp.float32, -bound2, bound2)
    return w1, b1, w2, b2


if __name__ == "__main__":
    key = jax.random.PRNGKey(0)
    kx, kp = jax.random.split(key)
    batch = 8
    x = jax.random.normal(kx, (batch, INPUT_SIZE), jnp.float32)
    w1, b1, w2, b2 = init_params(kp)

    out = feedforward_nn(x, w1, b1, w2, b2)
    out = jax.block_until_ready(out)

    # Pure-JAX reference (PyTorch semantics: x @ W.T + b).
    ref = jnp.maximum(x @ w1.T + b1, 0.0) @ w2.T + b2
    assert out.shape == (batch, OUTPUT_SIZE)
    assert jnp.allclose(out, ref, atol=1e-5, rtol=1e-5)
    print("KERNEL_OK")
</pallas_src>

<mosaic_0001>
module attributes {stable_mosaic.version = 11 : i64} {
  func.func @ffn_kernel(%arg0: i32, %arg1: memref<8x10xf32, #tpu.memory_space<vmem>>, %arg2: memref<20x10xf32, #tpu.memory_space<vmem>>, %arg3: memref<1x20xf32, #tpu.memory_space<vmem>>, %arg4: memref<5x20xf32, #tpu.memory_space<vmem>>, %arg5: memref<1x5xf32, #tpu.memory_space<vmem>>, %arg6: memref<8x5xf32, #tpu.memory_space<vmem>>) attributes {dimension_semantics = [#tpu.dimension_semantics<parallel>], iteration_bounds = array<i64: 1>, scalar_prefetch = 0 : i64, scratch_operands = 0 : i64, tpu.core_type = #tpu.core_type<tc>, window_params = [{transform_indices = @transform_0, window_bounds = array<i64: 8, 10>}, {pipeline_mode = #tpu.pipeline_mode<synchronous>, transform_indices = @transform_1, window_bounds = array<i64: 20, 10>}, {pipeline_mode = #tpu.pipeline_mode<synchronous>, transform_indices = @transform_2, window_bounds = array<i64: 1, 20>}, {pipeline_mode = #tpu.pipeline_mode<synchronous>, transform_indices = @transform_3, window_bounds = array<i64: 5, 20>}, {pipeline_mode = #tpu.pipeline_mode<synchronous>, transform_indices = @transform_4, window_bounds = array<i64: 1, 5>}, {transform_indices = @transform_5, window_bounds = array<i64: 8, 5>}]} {
    %c0 = arith.constant 0 : index
    %c0_0 = arith.constant 0 : index
    %0 = vector.load %arg1[%c0, %c0_0] : memref<8x10xf32, #tpu.memory_space<vmem>>, vector<8x10xf32>
    %c0_1 = arith.constant 0 : index
    %c0_2 = arith.constant 0 : index
    %1 = vector.load %arg2[%c0_1, %c0_2] : memref<20x10xf32, #tpu.memory_space<vmem>>, vector<20x10xf32>
    %cst = arith.constant dense<0.000000e+00> : vector<8x20xf32>
    %2 = tpu.matmul %0, %1, %cst {dimension_numbers = #tpu.dot_dimension_numbers<[1], [1], [0], [0], [0, 0, 1, 0], [], []>} : vector<8x10xf32>, vector<20x10xf32>, vector<8x20xf32> -> vector<8x20xf32>
    %c0_3 = arith.constant 0 : index
    %c0_4 = arith.constant 0 : index
    %3 = vector.load %arg3[%c0_3, %c0_4] : memref<1x20xf32, #tpu.memory_space<vmem>>, vector<1x20xf32>
    %4 = vector.broadcast %3 : vector<1x20xf32> to vector<8x20xf32>
    %5 = arith.addf %2, %4 : vector<8x20xf32>
    %cst_5 = arith.constant 0.000000e+00 : f32
    %6 = vector.broadcast %cst_5 : f32 to vector<8x20xf32>
    %7 = arith.maximumf %5, %6 : vector<8x20xf32>
    %c0_6 = arith.constant 0 : index
    %c0_7 = arith.constant 0 : index
    %8 = vector.load %arg4[%c0_6, %c0_7] : memref<5x20xf32, #tpu.memory_space<vmem>>, vector<5x20xf32>
    %cst_8 = arith.constant dense<0.000000e+00> : vector<8x5xf32>
    %9 = tpu.matmul %7, %8, %cst_8 {dimension_numbers = #tpu.dot_dimension_numbers<[1], [1], [0], [0], [0, 0, 1, 0], [], []>} : vector<8x20xf32>, vector<5x20xf32>, vector<8x5xf32> -> vector<8x5xf32>
    %c0_9 = arith.constant 0 : index
    %c0_10 = arith.constant 0 : index
    %10 = vector.load %arg5[%c0_9, %c0_10] : memref<1x5xf32, #tpu.memory_space<vmem>>, vector<1x5xf32>
    %11 = vector.broadcast %10 : vector<1x5xf32> to vector<8x5xf32>
    %12 = arith.addf %9, %11 : vector<8x5xf32>
    %c0_11 = arith.constant 0 : index
    %c0_12 = arith.constant 0 : index
    %13 = vector.load %arg6[%c0_11, %c0_12] : memref<8x5xf32, #tpu.memory_space<vmem>>, vector<8x5xf32>
    tpu.vector_store %arg6[%c0_11, %c0_12], %12 {strides = array<i32>} : memref<8x5xf32, #tpu.memory_space<vmem>>, vector<8x5xf32>,
    return
  }
  func.func @transform_0(%arg0: i32) -> (i32, i32) {
    %c0_i32 = arith.constant 0 : i32
    %c0_i32_0 = arith.constant 0 : i32
    return %arg0, %c0_i32 : i32, i32
  }
  func.func @transform_1(%arg0: i32) -> (i32, i32) {
    %c0_i32 = arith.constant 0 : i32
    %c0_i32_0 = arith.constant 0 : i32
    %c0_i32_1 = arith.constant 0 : i32
    return %c0_i32, %c0_i32_0 : i32, i32
  }
  func.func @transform_2(%arg0: i32) -> (i32, i32) {
    %c0_i32 = arith.constant 0 : i32
    %c0_i32_0 = arith.constant 0 : i32
    %c0_i32_1 = arith.constant 0 : i32
    return %c0_i32, %c0_i32_0 : i32, i32
  }
  func.func @transform_3(%arg0: i32) -> (i32, i32) {
    %c0_i32 = arith.constant 0 : i32
    %c0_i32_0 = arith.constant 0 : i32
    %c0_i32_1 = arith.constant 0 : i32
    return %c0_i32, %c0_i32_0 : i32, i32
  }
  func.func @transform_4(%arg0: i32) -> (i32, i32) {
    %c0_i32 = arith.constant 0 : i32
    %c0_i32_0 = arith.constant 0 : i32
    %c0_i32_1 = arith.constant 0 : i32
    return %c0_i32, %c0_i32_0 : i32, i32
  }
  func.func @transform_5(%arg0: i32) -> (i32, i32) {
    %c0_i32 = arith.constant 0 : i32
    %c0_i32_0 = arith.constant 0 : i32
    return %arg0, %c0_i32 : i32, i32
  }
}

</mosaic_0001>

<bundles_post_ra>
// kernel: feedforward_nn.1
= control target key start
LH: loop header
LB: loop body
LE: loop exit
PB: predicated region body
PF: predicated region fallthrough
CT: control target
= control target key end

     0   :  { %vm32_vm0 = vcmask 80896   ;;  %v277_v2 = vmov 0.0|0.0   ;;  %vm278_vm2 = vmmov 0   ;;  %v279_v4 = vmov 0.0   ;;  %s348_s0 = inlined_call_operand.vmem [shape: f32[8,10], index: 0, kind: input, shape index: {}]   ;;  %s349_s1 = inlined_call_operand.vmem [shape: f32[20,10], index: 1, kind: input, shape index: {}]   ;;  %s350_s2 = inlined_call_operand.vmem [shape: f32[1,20], index: 2, kind: input, shape index: {}]   ;;  %s351_s3 = inlined_call_operand.vmem [shape: f32[5,20], index: 3, kind: input, shape index: {}]   ;;  %s352_s4 = inlined_call_operand.vmem [shape: f32[1,5], index: 4, kind: input, shape index: {}]   ;;  %s353_s5 = inlined_call_operand.hbm [shape: f32[8,5], index: 5, kind: output, shape index: {}]  }
   0x1   :  { %v22_v0 = vld [vmem:[%s349_s1] sm:$0xff]  ;;  %v23_v1 = vld [vmem:[%s349_s1 + $0x8] sm:$0xff]  ;;  %245 = vmatprep.subr.bf16.mxu0 %v277_v2  ;;  %vm247_vm1 = vmpackc.low %vm32_vm0, %vm32_vm0  ;;  %237 = vmatprep.mubr.msk.f32.mxu0 %vm278_vm2, %v279_v4 }
   0x2   :  { %v246_v3 = vpack.c.bf16 %v23_v1, %v22_v0  ;;  %240 = vmatprep.subr.mxu1 %v279_v4  ;;  %242 = vmatprep.mubr.msk.f32.mxu1 %vm278_vm2, %v279_v4 }
   0x3   :  { %10 = vsyncpa [#allocation3], 0  ;;  %v24_v5 = vld [vmem:[%s349_s1 + $0x10] sm:$0xf]  ;;  %v21_v6 = vld [vmem:[%s348_s0] sm:$0xff]  ;;  %vm124_vm3 = vcmask 162816  }
   0x4   :  { %248 = vmatpush3.bf16.xpose.msk.msra.mxu0 %vm247_vm1, %v246_v3  ;;  %v116_v7 = vld [vmem:[%s351_s3] sm:$0x1f]  ;;  %s280_s0 = smov [#allocation2]   ;;  %vm201_vm4 = vcmask 39936  }
   0x5   :  { %235 = vmatprep.subr.mxu0 %v279_v4  ;;  %241 = vmatpush3.xpose.msk.msra.mxu1 %vm124_vm3, %v116_v7  ;;  %v217_v8 = vld [vmem:[%s350_s2] ss:$0 sm:$0xff]  ;;  %s209_s6 = sshll.u32 %s280_s0, 4  ;;  %s210_s6 = int_to_ptr.vmem [resolvable:$true] %s209_s6 }
   0x6   :  { %v222_v13 = vld [vmem:[%s352_s4] ss:$0 sm:$0xff]  ;;  %s253_s3 = scalar_lea.vmem %s210_s6, 128  ;;  %p258_p1 = scmp.lt.s32.totalorder %s210_s6, %s210_s6 }
   0x7   :  { %p254_p0 = scmp.ne.s32.totalorder %s210_s6, %s253_s3  ;;  %p259_p2 = scmp.lt.s32.totalorder %s253_s3, %s253_s3 }
   0x9   :  { %p260_p3 = por %p259_p2, %p258_p1 }
   0xb   :  { %p261_p4 = pnand %p260_p3, %p254_p0 }
   0xc   :  { %236 = vmatpush3.xpose.msk.msra.mxu0 %vm32_vm0, %v24_v5 }
   0xf   :  { %238 = vmatmul.mubr.msk.f32.vlgmr.msra.gmra.mrb[0].mxu0 %vm32_vm0, %v21_v6 }
  0xe2   :  { %v111_v9 = vpop.f32.mrb[0].mxu0 }
  0xe3   :  { %v112_v10 = vadd.f32 %v217_v8, %v111_v9  ;;  %v239_v11 = vpop.f32.mrb[1].mxu0 }
  0xe5   :  { %v115_v12 = vmax.f32 %v112_v10, 0.0 }
  0xe7   :  { %243 = vmatmul.mubr.msk.f32.vlgmr.msra.gmra.mrb[0].mxu1 %vm124_vm3, %v115_v12 }
 0x1ba   :  { %v197_v14 = vpop.f32.mrb[0].mxu1 }
 0x1bb   :  { %v198_v15 = vadd.f32 %v222_v13, %v197_v14  ;;  %v244_v16 = vpop.f32.mrb[1].mxu1 }
 0x1bd   :  { %202 = vst.msk [vmem:[#allocation2] sm:$0xff] %vm201_vm4, %v198_v15 }
 0x1be   :  { %264 = shalt.err (!%p261_p4)
}
 0x1bf   :  { %s265_s8 = scalar_lea.hbm %s353_s5, 128 }
 0x1c0   :  { %p266_p5 = scmp.ne.s32.totalorder %s353_s5, %s265_s8  ;;  %p269_p6 = scmp.lt.u32.totalorder %s265_s8, %s353_s5 }
 0x1c2   :  { %p271_p7 = pnand %p269_p6, %p266_p5 }
 0x1c4   :  { %274 = shalt.err (!%p271_p7)
}
 0x1c5   :  { %212 = dma.vmem_to_hbm [thread:$0]  %s210_s6, 128, %s353_s5, [#allocation3]  }
 0x1c6   :  { %275 = dma.done.wait [#allocation3], 128  }
 0x1c7   :  { %276 = vsyncadd [#allocation3], 4294967168 }
 0x1c8   :  { %216 = vsyncpa [#allocation3], 1 }

</bundles_post_ra>
